<compile_context>
chip_gen: v7x
topology: tpu7x:2x2x1
jax: 0.10.0
libtpu: 0.0.40
codegen_flags: <defaults>
</compile_context>

<pallas_src>
import functools

import jax
import jax.numpy as jnp
from jax import lax
from jax.experimental import pallas as pl
from jax.experimental.pallas import tpu as pltpu


# ---------------------------------------------------------------------------
# Kernel 1: fused QKV projection, computed once per (batch, row-tile).
# ---------------------------------------------------------------------------
def _qkv_proj_kernel(x_ref, wqkv_ref, bqkv_ref, qkv_ref):
    # x_ref:    (1, Tr, D) f32
    # wqkv_ref: (D, 3D)    bf16   packed [Wq*(1/D) | Wk | Wv]  (pre-transposed: y = x @ W + b)
    # bqkv_ref: (1, 3D)    f32    packed [bq*(1/D) | bk | bv]
    # qkv_ref:  (1, Tr, 3D) bf16
    x = x_ref[0].astype(jnp.bfloat16)                                  # bf16 MXU operand
    acc = jnp.dot(x, wqkv_ref[...], preferred_element_type=jnp.float32) + bqkv_ref[...]
    qkv_ref[0] = acc.astype(qkv_ref.dtype)


# ---------------------------------------------------------------------------
# Kernel 2: per-head attention + final intra-head MLP over a query-row tile.
# ---------------------------------------------------------------------------
def _attn_kernel(qkv_ref, wo_ref, bo_ref, o_ref, ctx_ref, *, num_heads, q_tile):
    # qkv_ref: (1, S, 3D) bf16 — resident across the query-tile axis (index_map (bi,0,0))
    # wo_ref:  (D, D)     bf16 — final intra-head MLP weight (pre-transposed)
    # bo_ref:  (1, D)     f32
    # o_ref:   (1, Tq, D)
    # ctx_ref: (Tq, D) f32 VMEM scratch — per-head contexts written at static column offsets
    d_model = wo_ref.shape[0]
    dh = d_model // num_heads
    si = pl.program_id(1)
    row0 = pl.multiple_of(si * q_tile, q_tile)

    # Query rows sliced out of the already-resident full-sequence block
    # (sublane slice at a multiple-of-Tq offset: no extra DMA, no relayout).
    q_all = qkv_ref[0, pl.ds(row0, q_tile), pl.ds(0, d_model)]          # (Tq, D)  bf16
    kv = qkv_ref[0, :, pl.ds(d_model, 2 * d_model)]                     # (S, 2D)  bf16

    # Per-head attention; H is small & static, slices/offsets are static so the
    # stores into ctx_ref are plain stores and each head's intermediates die there.
    # Note: the 1/d_model scale is already folded into Wq/bq (q_all is pre-scaled).
    for h in range(num_heads):
        lo = h * dh
        qh = q_all[:, lo:lo + dh]                                       # (Tq, dh) bf16
        kh = kv[:, lo:lo + dh]                                          # (S, dh)  bf16
        vh = kv[:, d_model + lo:d_model + lo + dh]                      # (S, dh)  bf16

        # q @ k^T without materializing a transpose: contract dh of both operands.
        scores = lax.dot_general(
            qh, kh, (((1,), (1,)), ((), ())),
            preferred_element_type=jnp.float32)                         # (Tq, S) f32
        scores = scores - jnp.max(scores, axis=-1, keepdims=True)
        e = jnp.exp(scores)                                             # f32 softmax math
        attn = e * pl.reciprocal(jnp.sum(e, axis=-1, keepdims=True), approx=True)
        ctx_ref[:, lo:lo + dh] = jnp.dot(attn.astype(jnp.bfloat16), vh,
                                         preferred_element_type=jnp.float32)

    # One dense final projection over the "concatenated" heads living in scratch.
    out = jnp.dot(ctx_ref[...].astype(jnp.bfloat16), wo_ref[...],
                  preferred_element_type=jnp.float32) + bo_ref[...]
    o_ref[0] = out.astype(o_ref.dtype)


# ---------------------------------------------------------------------------
# Host-side one-time weight packing (do this once, not per forward call).
# ---------------------------------------------------------------------------
def pack_params(params):
    """Pack per-head weights into MXU-friendly bf16 slabs; fold the 1/d_model scale."""
    wq, bq, wk, bk, wv, bv, wo, bo = (
        params["wq"], params["bq"], params["wk"], params["bk"],
        params["wv"], params["bv"], params["wo"], params["bo"])
    H, D, dh = wq.shape
    scale = 1.0 / D  # module divides scores by d_model, not sqrt(d_head) — fold into Wq/bq

    # per-head (H, D, dh) -> lane-dense (D, H*dh); head h occupies columns
    # [h*dh, (h+1)*dh) — same order as torch.cat over the head list.
    pack_w = lambda w_: jnp.transpose(w_, (1, 0, 2)).reshape(D, H * dh)
    pack_b = lambda b_: b_.reshape(1, H * dh)
    wqkv = jnp.concatenate(
        [pack_w(wq) * scale, pack_w(wk), pack_w(wv)], axis=-1).astype(jnp.bfloat16)
    bqkv = jnp.concatenate(
        [pack_b(bq) * scale, pack_b(bk), pack_b(bv)], axis=-1).astype(jnp.float32)
    return {
        "wqkv": wqkv,                                   # (D, 3D) bf16
        "bqkv": bqkv,                                   # (1, 3D) f32
        "wo": wo.astype(jnp.bfloat16),                  # (D, D)  bf16
        "bo": bo.reshape(1, D).astype(jnp.float32),     # (1, D)  f32
        "num_heads": H,
        "d_model": D,
    }


def multi_head_attention_block(x, packed, *, q_tile=256, row_tile=256):
    """x: (B, S, D) float32.  packed: output of pack_params()."""
    B, S, D = x.shape
    H = packed["num_heads"]
    assert packed["d_model"] == D

    # Tune per chip: <=48 MiB on v7x (64 MiB physical VMEM), up to 96 MiB on v6e/v5e.
    vmem_limit = 64 * 1024 * 1024

    # ---- Kernel 1: QKV projection, once per row (no per-query-tile recompute). ----
    Tr = S if S <= row_tile else row_tile
    assert S % Tr == 0, "sequence length must be divisible by the row tile"
    const2 = lambda shape: pl.BlockSpec(shape, lambda bi, ri: (0,) * len(shape))
    qkv = pl.pallas_call(
        _qkv_proj_kernel,
        out_shape=jax.ShapeDtypeStruct((B, S, 3 * D), jnp.bfloat16),
        grid_spec=pltpu.PrefetchScalarGridSpec(
            num_scalar_prefetch=0,
            grid=(B, S // Tr),
            in_specs=[
                pl.BlockSpec((1, Tr, D), lambda bi, ri: (bi, ri, 0)),   # x row tile
                const2((D, 3 * D)),                                     # packed Wqkv (bf16)
                const2((1, 3 * D)),                                     # packed bqkv (f32)
            ],
            out_specs=pl.BlockSpec((1, Tr, 3 * D), lambda bi, ri: (bi, ri, 0)),
        ),
        compiler_params=pltpu.CompilerParams(
            dimension_semantics=("parallel", "parallel"),
            vmem_limit_bytes=vmem_limit,
        ),
    )(x, packed["wqkv"], packed["bqkv"])

    # ---- Kernel 2: attention + final MLP over query-row tiles. ----
    Tq = S if S <= q_tile else q_tile
    # Make sure both v7x TensorCores get work when B == 1 and S fits in one tile.
    if B * (S // Tq) < 2 and Tq % 2 == 0 and (Tq // 2) % 8 == 0:
        Tq //= 2
    assert S % Tq == 0, "sequence length must be divisible by the query tile"

    kernel = functools.partial(_attn_kernel, num_heads=H, q_tile=Tq)
    return pl.pallas_call(
        kernel,
        out_shape=jax.ShapeDtypeStruct((B, S, D), x.dtype),
        grid_spec=pltpu.PrefetchScalarGridSpec(
            num_scalar_prefetch=0,
            grid=(B, S // Tq),
            in_specs=[
                # Full-sequence qkv block; index doesn't change across the si axis,
                # so it stays resident in VMEM for the whole batch element.
                pl.BlockSpec((1, S, 3 * D), lambda bi, si: (bi, 0, 0)),
                pl.BlockSpec((D, D), lambda bi, si: (0, 0)),            # Wo (bf16)
                pl.BlockSpec((1, D), lambda bi, si: (0, 0)),            # bo (f32)
            ],
            out_specs=pl.BlockSpec((1, Tq, D), lambda bi, si: (bi, si, 0)),
            scratch_shapes=[pltpu.VMEM((Tq, D), jnp.float32)],
        ),
        compiler_params=pltpu.CompilerParams(
            dimension_semantics=("parallel", "parallel"),
            vmem_limit_bytes=vmem_limit,
        ),
    )(qkv, packed["wo"], packed["bo"])


# ---------------------------------------------------------------------------
# Pure-JAX reference of the PyTorch forward pass (eval mode), all f32.
# ---------------------------------------------------------------------------
def _reference(x, params):
    D = x.shape[-1]
    wq, bq, wk, bk, wv, bv, wo, bo = (
        params["wq"], params["bq"], params["wk"], params["bk"],
        params["wv"], params["bv"], params["wo"], params["bo"])
    H = wq.shape[0]
    outs = []
    for h in range(H):
        q = x @ wq[h] + bq[h]
        k = x @ wk[h] + bk[h]
        v = x @ wv[h] + bv[h]
        scores = jnp.einsum("bqd,bkd->bqk", q, k) / D
        attn = jax.nn.softmax(scores, axis=-1)
        outs.append(jnp.einsum("bqk,bkd->bqd", attn, v))
    concat = jnp.concatenate(outs, axis=-1)
    return concat @ wo + bo


def init_params(key, num_heads, d_model):
    d_head = d_model // num_heads
    ks = jax.random.split(key, 8)
    s = 1.0 / jnp.sqrt(d_model)   # PyTorch Linear init bound ~ 1/sqrt(in_features)
    u = lambda k, shape: jax.random.uniform(k, shape, jnp.float32, -s, s)
    return {
        "wq": u(ks[0], (num_heads, d_model, d_head)),
        "bq": u(ks[1], (num_heads, 1, d_head)),
        "wk": u(ks[2], (num_heads, d_model, d_head)),
        "bk": u(ks[3], (num_heads, 1, d_head)),
        "wv": u(ks[4], (num_heads, d_model, d_head)),
        "bv": u(ks[5], (num_heads, 1, d_head)),
        "wo": u(ks[6], (d_model, d_model)),
        "bo": u(ks[7], (1, d_model)),
    }


if __name__ == "__main__":
    B, S, d_model, num_heads = 2, 8, 32, 4

    key = jax.random.PRNGKey(0)
    kx, kp = jax.random.split(key)
    x = jax.random.normal(kx, (B, S, d_model), dtype=jnp.float32)
    params = init_params(kp, num_heads, d_model)

    # One-time packing (bf16 weights, 1/d_model folded into Wq/bq) — outside the call.
    packed = pack_params(params)

    out = jax.block_until_ready(multi_head_attention_block(x, packed))
    ref = _reference(x, params)

    assert out.shape == (B, S, d_model)
    # bf16 MXU operands (with f32 accumulation / f32 softmax) + approx reciprocal give
    # ~1e-3-level absolute deviation vs the all-f32 reference at these shapes.
    assert jnp.allclose(out, ref, atol=2e-2, rtol=2e-2), "mismatch vs reference"
    print("KERNEL_OK")
</pallas_src>

<mosaic_0001>
module attributes {stable_mosaic.version = 11 : i64} {
  func.func @_qkv_proj_kernel(%arg0: i32, %arg1: i32, %arg2: memref<1x8x32xf32, #tpu.memory_space<vmem>>, %arg3: memref<32x96xbf16, #tpu.memory_space<vmem>>, %arg4: memref<1x96xf32, #tpu.memory_space<vmem>>, %arg5: memref<1x8x96xbf16, #tpu.memory_space<vmem>>) attributes {dimension_semantics = [#tpu.dimension_semantics<parallel>, #tpu.dimension_semantics<parallel>], iteration_bounds = array<i64: 2, 1>, scalar_prefetch = 0 : i64, scratch_operands = 0 : i64, tpu.core_type = #tpu.core_type<tc>, window_params = [{transform_indices = @transform_0, window_bounds = array<i64: 1, 8, 32>}, {pipeline_mode = #tpu.pipeline_mode<synchronous>, transform_indices = @transform_1, window_bounds = array<i64: 32, 96>}, {pipeline_mode = #tpu.pipeline_mode<synchronous>, transform_indices = @transform_2, window_bounds = array<i64: 1, 96>}, {transform_indices = @transform_3, window_bounds = array<i64: 1, 8, 96>}]} {
    %c0 = arith.constant 0 : index
    %c0_0 = arith.constant 0 : index
    %c0_1 = arith.constant 0 : index
    %0 = vector.load %arg2[%c0, %c0_0, %c0_1] : memref<1x8x32xf32, #tpu.memory_space<vmem>>, vector<1x8x32xf32>
    %1 = vector.shape_cast %0 : vector<1x8x32xf32> to vector<8x32xf32>
    %2 = arith.truncf %1 : vector<8x32xf32> to vector<8x32xbf16>
    %c0_2 = arith.constant 0 : index
    %c0_3 = arith.constant 0 : index
    %3 = vector.load %arg3[%c0_2, %c0_3] : memref<32x96xbf16, #tpu.memory_space<vmem>>, vector<32x96xbf16>
    %cst = arith.constant dense<0.000000e+00> : vector<8x96xf32>
    %4 = tpu.matmul %2, %3, %cst {dimension_numbers = #tpu.dot_dimension_numbers<[1], [0], [0], [1], [0, 0, 1, 1], [], []>} : vector<8x32xbf16>, vector<32x96xbf16>, vector<8x96xf32> -> vector<8x96xf32>
    %c0_4 = arith.constant 0 : index
    %c0_5 = arith.constant 0 : index
    %5 = vector.load %arg4[%c0_4, %c0_5] : memref<1x96xf32, #tpu.memory_space<vmem>>, vector<1x96xf32>
    %6 = vector.broadcast %5 : vector<1x96xf32> to vector<8x96xf32>
    %7 = arith.addf %4, %6 : vector<8x96xf32>
    %8 = arith.truncf %7 : vector<8x96xf32> to vector<8x96xbf16>
    %c0_6 = arith.constant 0 : index
    %c0_7 = arith.constant 0 : index
    %c0_8 = arith.constant 0 : index
    %9 = vector.load %arg5[%c0_6, %c0_7, %c0_8] : memref<1x8x96xbf16, #tpu.memory_space<vmem>>, vector<1x8x96xbf16>
    %10 = vector.shape_cast %9 : vector<1x8x96xbf16> to vector<8x96xbf16>
    %11 = vector.shape_cast %8 : vector<8x96xbf16> to vector<1x8x96xbf16>
    tpu.vector_store %arg5[%c0_6, %c0_7, %c0_8], %11 {strides = array<i32>} : memref<1x8x96xbf16, #tpu.memory_space<vmem>>, vector<1x8x96xbf16>,
    return
  }
  func.func @transform_0(%arg0: i32, %arg1: i32) -> (i32, i32, i32) {
    %c0_i32 = arith.constant 0 : i32
    %c0_i32_0 = arith.constant 0 : i32
    return %arg0, %arg1, %c0_i32 : i32, i32, i32
  }
  func.func @transform_1(%arg0: i32, %arg1: i32) -> (i32, i32) {
    %c0_i32 = arith.constant 0 : i32
    %c0_i32_0 = arith.constant 0 : i32
    %c0_i32_1 = arith.constant 0 : i32
    return %c0_i32, %c0_i32_0 : i32, i32
  }
  func.func @transform_2(%arg0: i32, %arg1: i32) -> (i32, i32) {
    %c0_i32 = arith.constant 0 : i32
    %c0_i32_0 = arith.constant 0 : i32
    %c0_i32_1 = arith.constant 0 : i32
    return %c0_i32, %c0_i32_0 : i32, i32
  }
  func.func @transform_3(%arg0: i32, %arg1: i32) -> (i32, i32, i32) {
    %c0_i32 = arith.constant 0 : i32
    %c0_i32_0 = arith.constant 0 : i32
    return %arg0, %arg1, %c0_i32 : i32, i32, i32
  }
}

</mosaic_0001>

<bundles_post_ra>
// kernel: tpu_custom_call.1
= control target key start
LH: loop header
LB: loop body
LE: loop exit
PB: predicated region body
PF: predicated region fallthrough
CT: control target
= control target key end

     0   :  { %8 = vsyncpa [#allocation3], 0  ;;  %s992_s0 = inlined_call_operand.hbm [shape: f32[2,8,32], index: 0, kind: input, shape index: {}]   ;;  %s993_s1 = inlined_call_operand.hbm [shape: bf16[32,96], index: 1, kind: input, shape index: {}]   ;;  %s994_s2 = inlined_call_operand.hbm [shape: f32[1,96], index: 2, kind: input, shape index: {}]   ;;  %s995_s3 = inlined_call_operand.hbm [shape: bf16[2,8,96], index: 3, kind: output, shape index: {}]  }
   0x1   :  { %10 = vsyncpa [#allocation3 + $0x1], 0 }
   0x2   :  { %11 = vsyncpa [#allocation6], 0 }
   0x3   :  { %12 = vsyncpa [#allocation4], 0 }
   0x4   :  { %14 = vsyncpa [#allocation4 + $0x1], 0  ;;  %s740_s12 = smov 0   ;;  %s742_s13 = smov 0  }
   0x5   :  { %s744_s14 = smov 0   ;;  %s746_s15 = smov 0  }
   0x6   :  { %s748_s16 = smov 0   ;;  %s750_s17 = smov 0  }
   0x7 LB: > { %s417_s18 = sadd.s32 4294967295, %s710_s17   ;;  %s418_s19 = sadd.s32 4294967294, %s710_s17   ;;  %s710_s17 = sphi %s750_s17, %s20_s17   ;;  %s706_s16 = sphi %s748_s16, %s1017_s16   ;;  %s702_s15 = sphi %s746_s15, %s1016_s15   ;;  %s698_s14 = sphi %s744_s14, %s1015_s14   ;;  %s694_s13 = sphi %s742_s13, %s1014_s13   ;;  %s690_s12 = sphi %s740_s12, %s1013_s12  }
   0x8   : > { %p54_p0 = scmp.ne.s32.totalorder %s694_s13, %s690_s12  ;;  %p774_p1 = scmp.eq.s32.totalorder %s417_s18, 0 }
   0x9   : > { %p778_p2 = scmp.eq.s32.totalorder %s417_s18, 1  ;;  %p128_p3 = scmp.eq.s32.totalorder %s418_s19, 1 }
   0xa   : > { %s1000_s20 = scalar_select %p774_p1, 1, 0 }
   0xb   : > { %p784_p4 = por %p774_p1, %p54_p0  ;;  %p419_p5 = scmp.ge.s32.totalorder %s710_s17, 1 }
   0xc   : > { %p789_p6 = por %p128_p3, %p54_p0  ;;  %p135_p7 = scmp.lt.s32.totalorder %s710_s17, 3 }
   0xd   : > { %s1002_s22 = scalar_select %p784_p4, 1, 0 }
   0xe   : > { %s1003_s23 = scalar_select %p789_p6, 1, 0 }
   0xf   : > { %p794_p8 = pnand %p419_p5, %p135_p7  ;;  %s712_s25 = smov [#allocation5]  }
  0x10   : > { %s147_s26 = sshll.u32 %s712_s25, 4  ;;  %s713_s28 = smov [#allocation7]   ;;  %s798_s26 = int_to_ptr.vmem [resolvable:$true] %s147_s26 }
  0x11   : > { %p461_p9 = pneg %p794_p8  ;;  %s161_s29 = sshll.u32 %s713_s28, 4  ;;  %s809_s29 = int_to_ptr.vmem [resolvable:$true] %s161_s29 }
  0x12   : > { %s538_s5 = scalar_lea.hbm %s993_s1, 256 }
  0x13   : > { %p805_p11 = pnand %p461_p9, %p774_p1  ;;  %p539_p12 = scmp.ne.s32.totalorder %s993_s1, %s538_s5 }
  0x14   : > { %p545_p5 = scmp.lt.u32.totalorder %s538_s5, %s993_s1 }
  0x15   : > { %p540_p13 = pneg %p805_p11 }
  0x17   : > { %p541_p0 = pnand %p540_p13, %p539_p12 }
  0x19   : > { %p542_p3 = pneg %p541_p0 }
  0x1b   : > { %p547_p7 = pnand %p545_p5, %p542_p3 }
  0x1d   : > { %550 = shalt.err (!%p547_p7)
}
  0x1e   : > { %s551_s10 = scalar_lea.vmem %s798_s26, 256  ;;  %p559_p1 = scmp.lt.s32.totalorder %s798_s26, %s798_s26 }
  0x1f   : > { %p552_p9 = scmp.ne.s32.totalorder %s798_s26, %s551_s10  ;;  %p560_p12 = scmp.lt.s32.totalorder %s551_s10, %s551_s10 }
  0x21   : > { %p554_p10 = pnand %p552_p9, %p540_p13  ;;  %p561_p0 = por %p560_p12, %p559_p1 }
  0x23   : > { %p555_p6 = pneg %p554_p10 }
  0x25   : > { %p562_p4 = pnand %p561_p0, %p555_p6 }
  0x27   : > { %565 = shalt.err (!%p562_p4)
}
  0x28   : > { %s714_s11 = smov 64   ;;  %s715_s18 = smov 4  }
  0x29   : > { %464 = dma.hbm_to_vmem [thread:$0]  (!%p805_p11), %s993_s1, 256, %s798_s26, [#allocation6], %s714_s11, %s714_s11, %s715_s18  }
  0x2a   : > { %s566_s4 = scalar_lea.hbm %s994_s2, 16 }
  0x2b   : > { %p567_p1 = scmp.ne.s32.totalorder %s994_s2, %s566_s4  ;;  %p573_p10 = scmp.lt.u32.totalorder %s566_s4, %s994_s2 }
  0x2d   : > { %p569_p4 = pnand %p567_p1, %p540_p13 }
  0x2f   : > { %p570_p6 = pneg %p569_p4 }
  0x31   : > { %p575_p3 = pnand %p573_p10, %p570_p6 }
  0x33   : > { %578 = shalt.err (!%p575_p3)
}
  0x34   : > { %s579_s26 = scalar_lea.vmem %s809_s29, 16  ;;  %s586_s9 = scalar_lea.vmem %s809_s29, 32 }
  0x35   : > { %p580_p5 = scmp.ne.s32.totalorder %s809_s29, %s579_s26  ;;  %p587_p12 = scmp.lt.s32.totalorder %s809_s29, %s809_s29 }
  0x36   : > { %p588_p0 = scmp.lt.s32.totalorder %s586_s9, %s579_s26 }
  0x37   : > { %p582_p7 = pnand %p580_p5, %p540_p13 }
  0x38   : > { %p589_p1 = por %p588_p0, %p587_p12 }
  0x39   : > { %p583_p9 = pneg %p582_p7 }
  0x3b   : > { %p590_p4 = pnand %p589_p1, %p583_p9 }
  0x3d   : > { %593 = shalt.err (!%p590_p4)
}
  0x3e   : > { %467 = dma.hbm_to_vmem [thread:$0]  (!%p805_p11), %s994_s2, 16, %s809_s29, [#allocation6]  }
  0x3f   : > { %s32_s18 = sadd.s32 1, %s706_s16  ;;  %s41_s19 = sadd.s32 1, %s698_s14 }
  0x40   : > { %p34_p13 = scmp.ge.s32.totalorder %s32_s18, 2  ;;  %p48_p6 = scmp.ne.s32.totalorder %s698_s14, %s694_s13 }
  0x41   : > { %p49_p10 = scmp.eq.s32.totalorder %s710_s17, 0  ;;  %p478_p3 = scmp.lt.s32.totalorder %s710_s17, 2 }
  0x42   : > { %s1019_s18 = smov (%p34_p13, %s32_s18), 0  ;;  %p874_p7 = por %p778_p2, %p48_p6 }
  0x43   : > { %p50_p5 = por %p49_p10, %p48_p6  ;;  %s36_s25 = ssub.s32 %s706_s16, %s1019_s18 }
  0x44   : > { %s1006_s27 = scalar_select %p874_p7, 1, 0 }
  0x45   : > { %s172_s28 = sand.u32 1, %s698_s14   ;;  %p39_p9 = scmp.eq.s32.totalorder %s36_s25, 0 }
  0x46   : > { %s423_s29 = sshll.u32 %s172_s28, 3  ;;  %s424_s30 = sshll.u32 %s706_s16, 7 }
  0x47   : > { %s883_s4 = scalar_select %p39_p9, %s698_s14, %s41_s19  }
  0x48   : > { %s888_s7 = scalar_lea.hbm %s992_s0, %s424_s30  ;;  %s176_s21 = scalar_lea.vmem [#allocation2], %s423_s29 }
  0x49   : > { %s184_s8 = sshll.u32 %s176_s21, 4  ;;  %p892_p2 = pnand %p478_p3, %p50_p5  ;;  %s896_s8 = int_to_ptr.vmem [resolvable:$true] %s184_s8 }
  0x4a   : > { %s173_s9 = scalar_lea.sflag [#allocation3], %s172_s28  ;;  %s594_s10 = scalar_lea.hbm %s888_s7, 128 }
  0x4b   : > { %p595_p11 = scmp.ne.s32.totalorder %s888_s7, %s594_s10  ;;  %p596_p12 = pneg %p892_p2 }
  0x4c   : > { %s599_s25 = scalar_lea.hbm %s992_s0, 256  ;;  %p600_p4 = scmp.lt.u32.totalorder %s888_s7, %s992_s0 }
  0x4d   : > { %p597_p0 = pnand %p596_p12, %p595_p11  ;;  %p601_p13 = scmp.lt.u32.totalorder %s599_s25, %s594_s10 }
  0x4e   : > { %p603_p10 = scmp.lt.u32.totalorder %s594_s10, %s888_s7 }
  0x4f   : > { %p598_p1 = pneg %p597_p0  ;;  %p602_p6 = por %p601_p13, %p600_p4 }
  0x51   : > { %p604_p3 = por %p603_p10, %p602_p6 }
  0x53   : > { %p605_p5 = pnand %p604_p3, %p598_p1 }
  0x55   : > { %608 = shalt.err (!%p605_p5)
}
  0x56   : > { %s609_s28 = scalar_lea.vmem %s896_s8, 128  ;;  %s716_s5 = smov [#allocation2]  }
  0x57   : > { %p610_p9 = scmp.ne.s32.totalorder %s896_s8, %s609_s28  ;;  %s614_s6 = sshll.u32 %s716_s5, 4  ;;  %s615_s6 = int_to_ptr.vmem [resolvable:$false] %s614_s6 }
  0x58   : > { %s616_s21 = scalar_lea.vmem %s615_s6, 256  ;;  %p617_p7 = scmp.lt.s32.totalorder %s896_s8, %s615_s6 }
  0x59   : > { %p612_p11 = pnand %p610_p9, %p596_p12  ;;  %p618_p4 = scmp.lt.s32.totalorder %s616_s21, %s609_s28 }
  0x5b   : > { %p613_p0 = pneg %p612_p11  ;;  %p619_p13 = por %p618_p4, %p617_p7 }
  0x5d   : > { %p620_p6 = pnand %p619_p13, %p613_p0 }
  0x5f   : > { %623 = shalt.err (!%p620_p6)
}
  0x60   : > { %471 = dma.hbm_to_vmem [thread:$0]  (!%p892_p2), %s888_s7, 128, %s896_s8, %s173_s9  }
  0x61   : > { %193 = sbr.rel (%p794_p8) target bundleno = 347 (0x15b), region = 32  ;;  %s926_s10 = sand.u32 (!%p794_p8), 1, %s694_s13  }
  0x62   : > { %s426_s11 = sshll.u32 (!%p794_p8), %s926_s10, 3  ;;  %s196_s19 = scalar_lea.sflag (!%p794_p8), [#allocation3], %s926_s10 }
  0x63   : > { %s199_s25 = scalar_lea.vmem (!%p794_p8), [#allocation2], %s426_s11  ;;  %p1008_p7 = scmp.ne.s32.totalorder (!%p794_p8), %s1002_s22, 0 }
  0x68   : > { %677 = dma.done.wait (%p1008_p7), %s196_s19, 128  }
  0x69   : > { %679 = vsyncadd (%p1008_p7), %s196_s19, 4294967168  ;;  %p1009_p12 = scmp.ne.s32.totalorder %s1000_s20, 0 }
  0x6b   : > { %681 = dma.done.wait (%p1009_p12), [#allocation6], 272  }
  0x6c   : > { %683 = vsyncadd (%p1009_p12), [#allocation6], 4294967024  ;;  %v717_v0 = vmov 0.0   ;;  %vm718_vm0 = vmmov 0   ;;  %v536_v1 = vld [vmem:[#allocation5] sm:$0xff]   ;;  %v537_v2 = vld [vmem:[#allocation5 + $0x8] sm:$0xff]  }
  0x6d   : > { %441 = vmatprep.subr.bf16.mxu0 %v717_v0  ;;  %445 = vmatprep.mubr.msk.bf16.mxu0 %vm718_vm0, %v717_v0  ;;  %v231_v3 = vld [vmem:[%s199_s25] sm:$0xff]  ;;  %vm256_vm1 = vcmask 261120   ;;  %s429_s22 = sshll.u32 %s926_s10, 2  ;;  %s435_s20 = sshll.u32 %s702_s15, 6  ;;  %vm301_vm2 = vcmask 781312  }
  0x6e   : > { %442 = vmatpush3.bf16.msra.mxu0 %v536_v1  ;;  %v232_v4 = vpack.c.bf16 %v231_v3, %v231_v3  ;;  %v430_v5 = vld [vmem:[#allocation7] ss:$0 sm:$0xff]  ;;  %s229_s24 = scalar_lea.vmem [#allocation8], %s429_s22  ;;  %s943_s9 = scalar_lea.hbm %s995_s3, %s435_s20 }
  0x6f   : > { %443 = vmatprep.subr.bf16.mxu0 %v717_v0  ;;  %s318_s7 = sshll.u32 %s229_s24, 4  ;;  %s304_s15 = scalar_lea.sflag [#allocation4], %s926_s10  ;;  %s945_s7 = int_to_ptr.vmem [resolvable:$true] %s318_s7 }
  0x70   : > { %s624_s29 = scalar_lea.vmem %s945_s7, 64  ;;  %p1010_p2 = scmp.ne.s32.totalorder %s1006_s27, 0 }
  0x71   : > { %p625_p8 = scmp.ne.s32.totalorder %s945_s7, %s624_s29  ;;  %s719_s30 = smov [#allocation8]  }
  0x72   : > { %444 = vmatpush3.bf16.msra.mxu0 %v537_v2  ;;  %s628_s28 = sshll.u32 %s719_s30, 4  ;;  %s629_s28 = int_to_ptr.vmem [resolvable:$false] %s628_s28 }
  0x73   : > { %p626_p1 = pnand %p625_p8, %p1010_p2  ;;  %s630_s5 = scalar_lea.vmem %s629_s28, 128 }
  0x74   : > { %p631_p3 = scmp.lt.s32.totalorder %s945_s7, %s629_s28  ;;  %p632_p5 = scmp.lt.s32.totalorder %s630_s5, %s624_s29 }
  0x75   : > { %446 = vmatmul.mubr.msk.bf16.vlgmr.msra.gmra.mrb[0].mxu0 %vm256_vm1, %v232_v4  ;;  %p627_p10 = pneg %p626_p1 }
  0x76   : > { %p633_p9 = por %p632_p5, %p631_p3 }
  0x78   : > { %p634_p11 = pnand %p633_p9, %p627_p10 }
 0x148   : > { %v294_v6 = vpop.f32.mrb[0].mxu0 }
 0x149   : > { %v295_v7 = vadd.f32 %v430_v5, %v294_v6  ;;  %v447_v8 = vpop.f32.mrb[1].mxu0 }
 0x14a   : > { %v297_v9 = vpop.f32.mrb[2].mxu0 }
 0x14b   : > { %v300_v10 = vpack.c.bf16 %v295_v7, %v295_v7  ;;  %v448_v11 = vpop.f32.mrb[3].mxu0 }
 0x14d   : > { %302 = vst.msk [vmem:[%s229_s24] sm:$0xf] %vm301_vm2, %v300_v10 }
 0x14e   : > { %637 = shalt.err (!%p634_p11)
}
 0x14f   : > { %s638_s6 = scalar_lea.hbm %s943_s9, 64  ;;  %s642_s11 = scalar_lea.hbm %s995_s3, 128 }
 0x150   : > { %p639_p0 = scmp.ne.s32.totalorder %s943_s9, %s638_s6  ;;  %p643_p6 = scmp.lt.u32.totalorder %s943_s9, %s995_s3 }
 0x151   : > { %p644_p7 = scmp.lt.u32.totalorder %s642_s11, %s638_s6  ;;  %p646_p8 = scmp.lt.u32.totalorder %s638_s6, %s943_s9 }
 0x152   : > { %p640_p4 = pnand %p639_p0, %p1010_p2 }
 0x153   : > { %p645_p12 = por %p644_p7, %p643_p6 }
 0x154   : > { %p641_p13 = pneg %p640_p4 }
 0x155   : > { %p647_p1 = por %p646_p8, %p645_p12 }
 0x157   : > { %p648_p10 = pnand %p647_p1, %p641_p13 }
 0x159   : > { %651 = shalt.err (!%p648_p10)
}
 0x15a   : > { %459 = dma.vmem_to_hbm [thread:$0]  (%p1010_p2), %s945_s7, 64, %s943_s9, %s304_s15  }
 0x15b PF: > { %s330_s22 = sand.u32 1, %s690_s12   ;;  %p1011_p3 = scmp.ne.s32.totalorder %s1003_s23, 0 }
 0x15c   : > { %p1012_p5 = scmp.ge.s32.totalorder %s710_s17, 2  ;;  %s331_s20 = scalar_lea.sflag [#allocation4], %s330_s22 }
 0x15e   : > { %p473_p9 = pnand %p1012_p5, %p1011_p3 }
 0x160   : > { %685 = dma.done.wait (!%p473_p9), %s331_s20, 64  }
 0x161   : > { %687 = vsyncadd (!%p473_p9), %s331_s20, 4294967232  ;;  %s20_s17 = sadd.s32 1, %s710_s17   ;;  %s1013_s12 = smov %s694_s13 }
 0x162   : > { %p17_p11 = scmp.ge.s32.totalorder %s20_s17, 4   ;;  %s1014_s13 = smov %s698_s14 }
 0x163   : > { %s1015_s14 = smov %s883_s4  ;;  %s1016_s15 = smov %s706_s16 }
 0x164   : > { %s1017_s16 = smov %s1019_s18  ;;  %19 = sbr.rel (!%p17_p11) target bundleno = 7 (0x7), region = 85 }
 0x16b   :  { %336 = vsyncpa [#allocation3], 1 }
 0x16c   :  { %338 = vsyncpa [#allocation3 + $0x1], 1 }
 0x16d   :  { %339 = vsyncpa [#allocation6], 1 }
 0x16e   :  { %340 = vsyncpa [#allocation4], 1 }
 0x16f   :  { %342 = vsyncpa [#allocation4 + $0x1], 1 }

</bundles_post_ra>
